<compile_context>
chip_gen: v7x
topology: tpu7x:2x2x1
jax: 0.10.0
libtpu: 0.0.40
codegen_flags: <defaults>
</compile_context>

<pallas_src>
import functools

import jax
import jax.numpy as jnp
from jax.experimental import pallas as pl
from jax.experimental.pallas import tpu as pltpu


def se_block_kernel(x_ref, w1_ref, w2_ref, o_ref, *, inv_hw):
    # x_ref/o_ref: (TB, C, HW) f32; w1_ref/w2_ref: (Cr, C) f32.

    # --- squeeze: global average pool over the (lane) spatial axis, per image.
    y = jnp.sum(x_ref[...], axis=-1) * inv_hw                        # (TB, C)

    # --- excitation: fc1 -> relu -> fc2 -> sigmoid on the VPU/XLU (shapes are
    # far too small for the MXU; broadcast-multiply + reduce instead).
    # h[b, j] = relu(sum_c y[b, c] * w1[j, c])      (lane reduce)
    h = jnp.maximum(
        jnp.sum(y[:, None, :] * w1_ref[...][None, :, :], axis=-1), 0.0)   # (TB, Cr)
    # s[b, c] = sigmoid(sum_j h[b, j] * w2[j, c])   (sublane reduce)
    s = jax.nn.sigmoid(
        jnp.sum(h[:, :, None] * w2_ref[...][None, :, :], axis=1))         # (TB, C)

    # --- scale: re-read x from VMEM (don't hold the tile in vregs across the MLP).
    o_ref[...] = x_ref[...] * s[:, :, None]


def _pick_batch_tile(b, per_image_bytes, target_bytes=2 << 20):
    """Images per grid step: ~target_bytes tile, >=2 grid steps, divides b."""
    tb = max(1, min(b, target_bytes // max(per_image_bytes, 1)))
    if b >= 2:
        tb = min(tb, -(-b // 2))        # keep at least 2 grid steps (v7x megacore)
    while b % tb != 0:                  # avoid a ragged final block
        tb -= 1
    return tb


def _vmem_cap_bytes():
    """~3/4 of physical VMEM: ~48 MiB on v7x, ~96 MiB on v5e/v6e."""
    try:
        phys = int(pltpu.get_tpu_info().vmem_capacity_bytes)
    except Exception:
        phys = 64 << 20                 # conservative fallback (v7x-sized)
    return (phys * 3) // 4


def se_block(x_nchw, w1, w2):
    """x_nchw: (B, C, H, W) f32. w1: (Cr, C) torch fc1 layout. w2: (Cr, C) = fc2.weight.T."""
    b, c, h, w = x_nchw.shape
    hw = h * w
    x_flat = x_nchw.reshape(b, c, hw)           # free (contiguous), no pad/slice

    itemsize = x_flat.dtype.itemsize
    per_image_bytes = c * hw * itemsize
    tb = _pick_batch_tile(b, per_image_bytes)
    grid = b // tb

    kernel = functools.partial(se_block_kernel, inv_hw=1.0 / hw)

    # VMEM budget: double-buffered input tile + double-buffered output tile
    # + weights + slack, clamped per-generation.
    # TODO(synk): if a single image (c * hw * 4 bytes) outgrows ~12 MiB (hit first
    # on v7x's 64 MiB VMEM), switch to a lane-aligned HW-chunked two-pass
    # squeeze/scale structure with grid=(B, n_chunks) instead of one full-spatial
    # tile per image.
    tile_bytes = tb * per_image_bytes
    w_bytes = (w1.size + w2.size) * w1.dtype.itemsize
    vmem_bytes = 4 * tile_bytes + 2 * w_bytes + (2 << 20)
    vmem_limit = int(min(max(vmem_bytes, 16 << 20), _vmem_cap_bytes()))

    out_flat = pl.pallas_call(
        kernel,
        out_shape=jax.ShapeDtypeStruct((b, c, hw), x_flat.dtype),
        grid_spec=pltpu.PrefetchScalarGridSpec(
            num_scalar_prefetch=0,
            grid=(grid,),
            in_specs=[
                pl.BlockSpec((tb, c, hw), lambda i: (i, 0, 0)),
                pl.BlockSpec(w1.shape, lambda i: (0, 0)),
                pl.BlockSpec(w2.shape, lambda i: (0, 0)),
            ],
            out_specs=pl.BlockSpec((tb, c, hw), lambda i: (i, 0, 0)),
        ),
        compiler_params=pltpu.CompilerParams(
            dimension_semantics=("parallel",),
            vmem_limit_bytes=vmem_limit,
        ),
    )(x_flat, w1, w2)

    return out_flat.reshape(b, c, h, w)


def se_block_reference(x_nchw, w1, w2):
    # pure-JAX reference for correctness check (same weight layouts as the kernel)
    y = jnp.mean(x_nchw, axis=(2, 3))                         # (B, C)
    hdn = jnp.maximum(y @ w1.T, 0.0)                          # (B, Cr)
    s = jax.nn.sigmoid(hdn @ w2)                              # (B, C)
    return x_nchw * s[:, :, None, None]


if __name__ == "__main__":
    key = jax.random.PRNGKey(0)
    k_x, k_w1, k_w2, k_x2 = jax.random.split(key, 4)

    B, C, ratio = 2, 32, 16          # inchannel=32, ratio=16 -> hidden Cr=2
    Cr = C // ratio

    # nn.init.normal_(weight, 0, 0.01); weight_norm at init leaves the effective
    # forward weight equal to the initialized weight (g = ||v||).
    w1 = 0.01 * jax.random.normal(k_w1, (Cr, C), dtype=jnp.float32)   # fc1 weight (out, in)
    w2 = 0.01 * jax.random.normal(k_w2, (Cr, C), dtype=jnp.float32)   # fc2 weight.T (in, out)

    # lane-aligned spatial case: 16*16 = 256
    x = jax.random.normal(k_x, (B, C, 16, 16), dtype=jnp.float32)
    out = jax.block_until_ready(se_block(x, w1, w2))
    ref = se_block_reference(x, w1, w2)
    assert out.shape == x.shape
    assert jnp.allclose(out, ref, atol=1e-5, rtol=1e-5), "mismatch vs reference (aligned)"

    # unaligned spatial case: 14*14 = 196 (full-dim block, no pad/slice, masked tail store)
    x2 = jax.random.normal(k_x2, (B, C, 14, 14), dtype=jnp.float32)
    out2 = jax.block_until_ready(se_block(x2, w1, w2))
    ref2 = se_block_reference(x2, w1, w2)
    assert out2.shape == x2.shape
    assert jnp.allclose(out2, ref2, atol=1e-5, rtol=1e-5), "mismatch vs reference (unaligned)"

    print("KERNEL_OK")
</pallas_src>

<mosaic_0001>
module attributes {stable_mosaic.version = 11 : i64} {
  func.func @se_block_kernel(%arg0: i32, %arg1: memref<1x32x256xf32, #tpu.memory_space<vmem>>, %arg2: memref<2x32xf32, #tpu.memory_space<vmem>>, %arg3: memref<2x32xf32, #tpu.memory_space<vmem>>, %arg4: memref<1x32x256xf32, #tpu.memory_space<vmem>>) attributes {dimension_semantics = [#tpu.dimension_semantics<parallel>], iteration_bounds = array<i64: 2>, scalar_prefetch = 0 : i64, scratch_operands = 0 : i64, tpu.core_type = #tpu.core_type<tc>, window_params = [{transform_indices = @transform_0, window_bounds = array<i64: 1, 32, 256>}, {pipeline_mode = #tpu.pipeline_mode<synchronous>, transform_indices = @transform_1, window_bounds = array<i64: 2, 32>}, {pipeline_mode = #tpu.pipeline_mode<synchronous>, transform_indices = @transform_2, window_bounds = array<i64: 2, 32>}, {transform_indices = @transform_3, window_bounds = array<i64: 1, 32, 256>}]} {
    %c0 = arith.constant 0 : index
    %c0_0 = arith.constant 0 : index
    %c0_1 = arith.constant 0 : index
    %0 = vector.load %arg1[%c0, %c0_0, %c0_1] : memref<1x32x256xf32, #tpu.memory_space<vmem>>, vector<1x32x256xf32>
    %cst = arith.constant dense<0.000000e+00> : vector<1x32xf32>
    %1 = vector.multi_reduction <add>, %0, %cst [2] : vector<1x32x256xf32> to vector<1x32xf32>
    %cst_2 = arith.constant 3.906250e-03 : f32
    %2 = vector.broadcast %cst_2 : f32 to vector<1x32xf32>
    %3 = arith.mulf %1, %2 : vector<1x32xf32>
    %4 = vector.shape_cast %3 : vector<1x32xf32> to vector<1x1x32xf32>
    %c0_3 = arith.constant 0 : index
    %c0_4 = arith.constant 0 : index
    %5 = vector.load %arg2[%c0_3, %c0_4] : memref<2x32xf32, #tpu.memory_space<vmem>>, vector<2x32xf32>
    %6 = vector.shape_cast %5 : vector<2x32xf32> to vector<1x2x32xf32>
    %7 = vector.broadcast %4 : vector<1x1x32xf32> to vector<1x2x32xf32>
    %8 = arith.mulf %7, %6 : vector<1x2x32xf32>
    %cst_5 = arith.constant dense<0.000000e+00> : vector<1x2xf32>
    %9 = vector.multi_reduction <add>, %8, %cst_5 [2] : vector<1x2x32xf32> to vector<1x2xf32>
    %cst_6 = arith.constant 0.000000e+00 : f32
    %10 = vector.broadcast %cst_6 : f32 to vector<1x2xf32>
    %11 = arith.maximumf %9, %10 : vector<1x2xf32>
    %12 = vector.shape_cast %11 : vector<1x2xf32> to vector<1x2x1xf32>
    %c0_7 = arith.constant 0 : index
    %c0_8 = arith.constant 0 : index
    %13 = vector.load %arg3[%c0_7, %c0_8] : memref<2x32xf32, #tpu.memory_space<vmem>>, vector<2x32xf32>
    %14 = vector.shape_cast %13 : vector<2x32xf32> to vector<1x2x32xf32>
    %15 = vector.broadcast %12 : vector<1x2x1xf32> to vector<1x2x32xf32>
    %16 = arith.mulf %15, %14 : vector<1x2x32xf32>
    %cst_9 = arith.constant dense<0.000000e+00> : vector<1x32xf32>
    %17 = vector.multi_reduction <add>, %16, %cst_9 [1] : vector<1x2x32xf32> to vector<1x32xf32>
    %18 = arith.negf %17 : vector<1x32xf32>
    %19 = math.exp %18 : vector<1x32xf32>
    %cst_10 = arith.constant 1.000000e+00 : f32
    %20 = vector.broadcast %cst_10 : f32 to vector<1x32xf32>
    %21 = arith.addf %20, %19 : vector<1x32xf32>
    %22 = arith.divf %20, %21 : vector<1x32xf32>
    %c0_11 = arith.constant 0 : index
    %c0_12 = arith.constant 0 : index
    %c0_13 = arith.constant 0 : index
    %23 = vector.load %arg1[%c0_11, %c0_12, %c0_13] : memref<1x32x256xf32, #tpu.memory_space<vmem>>, vector<1x32x256xf32>
    %24 = vector.shape_cast %22 : vector<1x32xf32> to vector<1x32x1xf32>
    %25 = vector.broadcast %24 : vector<1x32x1xf32> to vector<1x32x256xf32>
    %26 = arith.mulf %23, %25 : vector<1x32x256xf32>
    %c0_14 = arith.constant 0 : index
    %c0_15 = arith.constant 0 : index
    %c0_16 = arith.constant 0 : index
    %27 = vector.load %arg4[%c0_14, %c0_15, %c0_16] : memref<1x32x256xf32, #tpu.memory_space<vmem>>, vector<1x32x256xf32>
    tpu.vector_store %arg4[%c0_14, %c0_15, %c0_16], %26 {strides = array<i32>} : memref<1x32x256xf32, #tpu.memory_space<vmem>>, vector<1x32x256xf32>,
    return
  }
  func.func @transform_0(%arg0: i32) -> (i32, i32, i32) {
    %c0_i32 = arith.constant 0 : i32
    %c0_i32_0 = arith.constant 0 : i32
    %c0_i32_1 = arith.constant 0 : i32
    return %arg0, %c0_i32, %c0_i32_0 : i32, i32, i32
  }
  func.func @transform_1(%arg0: i32) -> (i32, i32) {
    %c0_i32 = arith.constant 0 : i32
    %c0_i32_0 = arith.constant 0 : i32
    %c0_i32_1 = arith.constant 0 : i32
    return %c0_i32, %c0_i32_0 : i32, i32
  }
  func.func @transform_2(%arg0: i32) -> (i32, i32) {
    %c0_i32 = arith.constant 0 : i32
    %c0_i32_0 = arith.constant 0 : i32
    %c0_i32_1 = arith.constant 0 : i32
    return %c0_i32, %c0_i32_0 : i32, i32
  }
  func.func @transform_3(%arg0: i32) -> (i32, i32, i32) {
    %c0_i32 = arith.constant 0 : i32
    %c0_i32_0 = arith.constant 0 : i32
    %c0_i32_1 = arith.constant 0 : i32
    return %arg0, %c0_i32, %c0_i32_0 : i32, i32, i32
  }
}

</mosaic_0001>

<bundles_post_ra>
// kernel: tpu_custom_call.1
= control target key start
LH: loop header
LB: loop body
LE: loop exit
PB: predicated region body
PF: predicated region fallthrough
CT: control target
= control target key end

     0   :  { %8 = vsyncpa [#allocation3], 0  ;;  %s891_s0 = inlined_call_operand.hbm [shape: f32[2,32,256], index: 0, kind: input, shape index: {}]   ;;  %s892_s1 = inlined_call_operand.vmem [shape: f32[2,32], index: 1, kind: input, shape index: {}]   ;;  %s893_s2 = inlined_call_operand.vmem [shape: f32[2,32], index: 2, kind: input, shape index: {}]   ;;  %s894_s3 = inlined_call_operand.hbm [shape: f32[2,32,256], index: 3, kind: output, shape index: {}]  }
   0x1   :  { %10 = vsyncpa [#allocation3 + $0x1], 0 }
   0x2   :  { %11 = vsyncpa [#allocation4], 0 }
   0x3   :  { %13 = vsyncpa [#allocation4 + $0x1], 0  ;;  %s687_s12 = smov 0   ;;  %s689_s13 = smov 0  }
   0x4   :  { %s691_s14 = smov 0   ;;  %s693_s15 = smov 0  }
   0x5 LB: > { %s708_s16 = sadd.s32 4294967295, %s658_s15   ;;  %s488_s17 = sadd.s32 4294967294, %s658_s15   ;;  %s658_s15 = sphi %s693_s15, %s907_s15   ;;  %s654_s14 = sphi %s691_s14, %s906_s14   ;;  %s650_s13 = sphi %s689_s13, %s905_s13   ;;  %s646_s12 = sphi %s687_s12, %s904_s12  }
   0x6   : > { %s712_s18 = sadd.s32 1, %s658_s15   ;;  %s26_s19 = sadd.s32 1, %s654_s14 }
   0x7   : > { %s23_s20 = ssub.s32 %s658_s15, %s712_s18  ;;  %p33_p0 = scmp.ne.s32.totalorder %s654_s14, %s650_s13 }
   0x8   : > { %p24_p1 = scmp.eq.s32.totalorder %s23_s20, 0  ;;  %p34_p2 = scmp.eq.s32.totalorder %s658_s15, 0 }
   0x9   : > { %p39_p3 = scmp.ne.s32.totalorder %s650_s13, %s646_s12  ;;  %p40_p4 = scmp.eq.s32.totalorder %s708_s16, 0 }
   0xa   : > { %s724_s21 = scalar_select %p24_p1, %s654_s14, %s26_s19  }
   0xb   : > { %p726_p5 = por %p34_p2, %p33_p0  ;;  %p730_p6 = por %p40_p4, %p39_p3 }
   0xc   : > { %p105_p7 = scmp.eq.s32.totalorder %s708_s16, 1  ;;  %p111_p8 = scmp.eq.s32.totalorder %s488_s17, 1 }
   0xd   : > { %p517_p10 = scmp.lt.s32.totalorder %s658_s15, 2  ;;  %s137_s26 = sand.u32 1, %s654_s14  }
   0xe   : > { %p737_p11 = por %p105_p7, %p33_p0  ;;  %p741_p12 = por %p111_p8, %p39_p3 }
   0xf   : > { %s503_s27 = sshll.u32 %s658_s15, 10  ;;  %s491_s28 = sshll.u32 %s137_s26, 6 }
  0x10   : > { %s898_s24 = scalar_select %p737_p11, 1, 0 }
  0x11   : > { %s899_s25 = scalar_select %p741_p12, 1, 0 }
  0x12   : > { %s750_s4 = scalar_lea.hbm %s891_s0, %s503_s27  ;;  %s141_s5 = scalar_lea.vmem [#allocation2], %s491_s28 }
  0x13   : > { %s148_s6 = sshll.u32 %s141_s5, 4  ;;  %p754_p13 = pnand %p517_p10, %p726_p5  ;;  %s758_s6 = int_to_ptr.vmem [resolvable:$true] %s148_s6 }
  0x14   : > { %s760_s8 = scalar_lea.sflag [#allocation3], %s137_s26  ;;  %s562_s9 = scalar_lea.hbm %s750_s4, 1024 }
  0x15   : > { %p563_p0 = scmp.ne.s32.totalorder %s750_s4, %s562_s9  ;;  %p564_p1 = pneg %p754_p13 }
  0x16   : > { %s567_s17 = scalar_lea.hbm %s891_s0, 2048  ;;  %p568_p4 = scmp.lt.u32.totalorder %s750_s4, %s891_s0 }
  0x17   : > { %p565_p2 = pnand %p564_p1, %p563_p0  ;;  %p569_p5 = scmp.lt.u32.totalorder %s567_s17, %s562_s9 }
  0x18   : > { %p571_p8 = scmp.lt.u32.totalorder %s562_s9, %s750_s4 }
  0x19   : > { %p566_p3 = pneg %p565_p2  ;;  %p570_p7 = por %p569_p5, %p568_p4 }
  0x1b   : > { %p572_p10 = por %p571_p8, %p570_p7 }
  0x1d   : > { %p573_p9 = pnand %p572_p10, %p566_p3 }
  0x1f   : > { %576 = shalt.err (!%p573_p9)
}
  0x20   : > { %s577_s22 = scalar_lea.vmem %s758_s6, 1024  ;;  %s660_s26 = smov [#allocation2]  }
  0x21   : > { %p578_p0 = scmp.ne.s32.totalorder %s758_s6, %s577_s22  ;;  %s582_s27 = sshll.u32 %s660_s26, 4  ;;  %s583_s27 = int_to_ptr.vmem [resolvable:$false] %s582_s27 }
  0x22   : > { %s584_s28 = scalar_lea.vmem %s583_s27, 2048  ;;  %p585_p11 = scmp.lt.s32.totalorder %s758_s6, %s583_s27 }
  0x23   : > { %p580_p2 = pnand %p578_p0, %p564_p1  ;;  %p586_p4 = scmp.lt.s32.totalorder %s584_s28, %s577_s22 }
  0x25   : > { %p581_p12 = pneg %p580_p2  ;;  %p587_p5 = por %p586_p4, %p585_p11 }
  0x27   : > { %p588_p7 = pnand %p587_p5, %p581_p12 }
  0x29   : > { %591 = shalt.err (!%p588_p7)
}
  0x2a   : > { %s661_s29 = smov 256   ;;  %s662_s30 = smov 16  }
  0x2b   : > { %512 = dma.hbm_to_vmem [thread:$0]  (!%p754_p13), %s750_s4, 1024, %s758_s6, %s760_s8, %s661_s29, %s661_s29, %s662_s30  }
  0x2c   : > { %p494_p9 = scmp.ge.s32.totalorder %s658_s15, 1  ;;  %p156_p1 = scmp.lt.s32.totalorder %s658_s15, 3 }
  0x2e   : > { %p157_p3 = pnand %p494_p9, %p156_p1 }
  0x2f   : > { %s791_s5 = sand.u32 (!%p157_p3), 1, %s650_s13  }
  0x30   : > { %160 = sbr.rel (%p157_p3) target bundleno = 689 (0x2b1), region = 32  ;;  %s495_s9 = sshll.u32 (!%p157_p3), %s791_s5, 6 }
  0x31   : > { %s163_s10 = scalar_lea.sflag (!%p157_p3), [#allocation3], %s791_s5  ;;  %s166_s11 = scalar_lea.vmem (!%p157_p3), [#allocation2], %s495_s9 }
  0x37   : > { %637 = dma.done.wait (%p730_p6), %s163_s10, 1024  }
  0x38   : > { %639 = vsyncadd (%p730_p6), %s163_s10, 4294966272  ;;  %v801_v0 = vld [vmem:[%s166_s11 + $0x20] sm:$0xff]  ;;  %v803_v1 = vld [vmem:[%s166_s11 + $0x28] sm:$0xff]  ;;  %v215_v12 = vlaneseq  ;;  %v663_v19 = vmov 0   ;;  %vm312_vm0 = vcmask 130112   ;;  %vm319_vm1 = vcmask 195712  }
  0x39   : > { %v805_v2 = vld [vmem:[%s166_s11] sm:$0xff]  ;;  %v203_v3 = vadd.f32 %v803_v1, %v801_v0  ;;  %v809_v4 = vld [vmem:[%s166_s11 + $0x8] sm:$0xff]  ;;  %v811_v5 = vld [vmem:[%s166_s11 + $0x30] sm:$0xff]  ;;  %557 = vset.pattern.permute.xlu1 %v663_v19  ;;  %556 = vset.pattern.permute.xlu0 %v663_v19  ;;  %vm326_vm2 = vcmask 261312   ;;  %vm347_vm3 = vcmask 1041409   ;;  %vm350_vm4 = vcmask 254976  }
  0x3a   : > { %v813_v6 = vld [vmem:[%s166_s11 + $0x38] sm:$0xff]  ;;  %v197_v7 = vadd.f32 %v809_v4, %v805_v2  ;;  %v817_v8 = vld [vmem:[%s166_s11 + $0x10] sm:$0xff]  ;;  %v216_v13 = vshrl.u32 %v215_v12, 7  ;;  %v213_v15 = vld [vmem:[%s892_s1] sm:$0x3]  ;;  %v302_v45 = vand.u32 127, %v215_v12 }
  0x3b   : > { %v819_v9 = vld [vmem:[%s166_s11 + $0x18] sm:$0xff]  ;;  %204 = vadd.xlane.f32.xlu1 %v203_v3  ;;  %v206_v10 = vadd.f32 %v813_v6, %v811_v5  ;;  %s188_s8 = scalar_lea.vmem [#allocation5], %s495_s9  ;;  %s504_s19 = sshll.u32 %s708_s16, 10 }
  0x3c   : > { %198 = vadd.xlane.f32.xlu0 %v197_v7  ;;  %v200_v11 = vadd.f32 %v819_v9, %v817_v8  ;;  %v217_v14 = vsub.s32 0, %v216_v13  ;;  %v236_v17 = vsub.s32 1, %v216_v13  ;;  %v307_v48 = vadd.s32 4294967288, %v302_v45  ;;  %s415_s17 = sshll.u32 %s188_s8, 4  ;;  %s845_s26 = scalar_lea.hbm %s894_s3, %s504_s19  ;;  %s840_s17 = int_to_ptr.vmem [resolvable:$true] %s415_s17 }
  0x3d   : > { %v314_v49 = vadd.s32 4294967280, %v302_v45  ;;  %v321_v50 = vadd.s32 4294967272, %v302_v45  ;;  %v305_v54 = vsub.s32 %v302_v45, %v216_v13  ;;  %s402_s16 = scalar_lea.sflag [#allocation4], %s791_s5  ;;  %s592_s27 = scalar_lea.vmem %s840_s17, 1024 }
  0x3e   : > { %v218_v16 = vrot.slane %v213_v15, %v217_v14  ;;  %v237_v18 = vrot.slane %v213_v15, %v236_v17  ;;  %v310_v53 = vsub.s32 %v307_v48, %v216_v13  ;;  %p593_p6 = scmp.ne.s32.totalorder %s840_s17, %s592_s27  ;;  %p901_p11 = scmp.ne.s32.totalorder %s898_s24, 0 }
  0x3f   : > { %207 = vadd.xlane.f32.xlu1 %v206_v10  ;;  %v317_v55 = vsub.s32 %v314_v49, %v216_v13  ;;  %v324_v56 = vsub.s32 %v321_v50, %v216_v13  ;;  %s664_s28 = smov [#allocation5]  }
  0x40   : > { %201 = vadd.xlane.f32.xlu0 %v200_v11  ;;  %p594_p12 = pnand %p593_p6, %p901_p11  ;;  %s596_s29 = sshll.u32 %s664_s28, 4  ;;  %s597_s29 = int_to_ptr.vmem [resolvable:$false] %s596_s29 }
  0x41   : > { %s598_s30 = scalar_lea.vmem %s597_s29, 2048  ;;  %p599_p8 = scmp.lt.s32.totalorder %s840_s17, %s597_s29 }
  0x42   : > { %p595_p13 = pneg %p594_p12  ;;  %p600_p10 = scmp.lt.s32.totalorder %s598_s30, %s592_s27 }
  0x44   : > { %p601_p0 = por %p600_p10, %p599_p8 }
  0x46   : > { %p602_p2 = pnand %p601_p0, %p595_p13 }
  0x50   : > { %224 = vbcast.lane.b32.xlu1 %v218_v16, 264 }
  0x54   : > { %239 = vbcast.lane.b32.xlu1 %v237_v18, 256 }
  0x56   : > { %220 = vbcast.lane.b32.xlu0 %v218_v16, 256 }
  0x58   : > { %243 = vbcast.lane.b32.xlu1 %v237_v18, 264 }
  0x5a   : > { %228 = vbcast.lane.b32.xlu0 %v218_v16, 272 }
  0x5c   : > { %247 = vbcast.lane.b32.xlu1 %v237_v18, 272 }
  0x5e   : > { %232 = vbcast.lane.b32.xlu0 %v218_v16, 280 }
  0x60   : > { %251 = vbcast.lane.b32.xlu1 %v237_v18, 280 }
  0xc8   : > { %v205_v20 = vpop.xlane.xlu1 %204 }
  0xc9   : > { %v199_v21 = vpop.xlane.xlu0 %198  ;;  %v211_v33 = vmul.f32 0.00390625, %v205_v20  ;;  %v355_v20 = vld [vmem:[%s893_s2] sm:$0x3] }
  0xca   : > { %v209_v25 = vmul.f32 0.00390625, %v199_v21 }
  0xcc   : > { %v208_v22 = vpop.xlane.xlu1 %207 }
  0xcd   : > { %v202_v23 = vpop.xlane.xlu0 %201  ;;  %v212_v38 = vmul.f32 0.00390625, %v208_v22 }
  0xce   : > { %v210_v24 = vmul.f32 0.00390625, %v202_v23 }
  0xd0   : > { %v225_v26 = vpop.permute.xlu1 %224 }
  0xd1   : > { %v262_v27 = vmul.f32 %v225_v26, %v210_v24  ;;  %v221_v28 = vpop.permute.xlu0 %220 }
  0xd2   : > { %v261_v29 = vmul.f32 %v221_v28, %v209_v25 }
  0xd3   : > { %281 = vperm.xlu1 %557, %v262_v27  }
  0xd4   : > { %278 = vperm.xlu0 %556, %v261_v29   ;;  %v240_v30 = vpop.permute.xlu1 %239 }
  0xd5   : > { %v265_v31 = vmul.f32 %v240_v30, %v209_v25  ;;  %v229_v32 = vpop.permute.xlu0 %228 }
  0xd6   : > { %v263_v35 = vmul.f32 %v229_v32, %v211_v33 }
  0xd7   : > { %290 = vperm.xlu1 %557, %v265_v31  }
  0xd8   : > { %v244_v34 = vpop.permute.xlu1 %243 }
  0xd9   : > { %v266_v36 = vmul.f32 %v244_v34, %v210_v24  ;;  %v233_v37 = vpop.permute.xlu0 %232 }
  0xda   : > { %v264_v40 = vmul.f32 %v233_v37, %v212_v38 }
  0xdb   : > { %293 = vperm.xlu0 %556, %v266_v36   ;;  %284 = vperm.xlu1 %557, %v263_v35  }
  0xdc   : > { %v248_v39 = vpop.permute.xlu1 %247 }
  0xdd   : > { %v267_v41 = vmul.f32 %v248_v39, %v211_v33 }
  0xdf   : > { %296 = vperm.xlu0 %556, %v267_v41   ;;  %287 = vperm.xlu1 %557, %v264_v40  }
  0xe0   : > { %v252_v42 = vpop.permute.xlu1 %251 }
  0xe1   : > { %v268_v43 = vmul.f32 %v252_v42, %v212_v38 }
  0xe3   : > { %299 = vperm.xlu0 %556, %v268_v43  }
 0x152   : > { %v282_v44 = vpop.permute.xlu1 %281 }
 0x153   : > { %v279_v46 = vpop.permute.xlu0 %278  ;;  %v311_v59 = vrot.slane %v282_v44, %v310_v53 }
 0x154   : > { %v306_v60 = vrot.slane %v279_v46, %v305_v54 }
 0x156   : > { %v291_v47 = vpop.permute.xlu1 %290  ;;  %v313_v11 = vsel %vm312_vm0, %v311_v59, %v306_v60 }
 0x157   : > { %v331_v3 = vrot.slane %v291_v47, %v305_v54 }
 0x15a   : > { %v285_v51 = vpop.permute.xlu1 %284  ;;  %v294_v52 = vpop.permute.xlu0 %293 }
 0x15b   : > { %v335_v61 = vrot.slane %v294_v52, %v310_v53  ;;  %v318_v62 = vrot.slane %v285_v51, %v317_v55 }
 0x15d   : > { %v336_v12 = vsel %vm312_vm0, %v335_v61, %v331_v3  ;;  %v320_v15 = vsel %vm319_vm1, %v318_v62, %v313_v11 }
 0x15e   : > { %v288_v57 = vpop.permute.xlu1 %287  ;;  %v297_v58 = vpop.permute.xlu0 %296 }
 0x15f   : > { %v340_v63 = vrot.slane %v297_v58, %v317_v55  ;;  %v325_v7 = vrot.slane %v288_v57, %v324_v56 }
 0x161   : > { %v341_v16 = vsel %vm319_vm1, %v340_v63, %v336_v12  ;;  %v327_v13 = vsel %vm326_vm2, %v325_v7, %v320_v15 }
 0x162   : > { %v300_v10 = vpop.permute.xlu0 %299 }
 0x163   : > { %v345_v14 = vrot.slane %v300_v10, %v324_v56 }
 0x165   : > { %v346_v17 = vsel %vm326_vm2, %v345_v14, %v341_v16 }
 0x166   : > { %v348_v18 = vsel %vm347_vm3, %v346_v17, %v327_v13 }
 0x167   : > { %v351_v19 = vsel %vm350_vm4, %v348_v18, 0.0 }
 0x168   : > { %352 = vadd.xlane.f32.xlu1 %v351_v19 }
 0x1f5   : > { %v353_v21 = vpop.xlane.xlu1 %352 }
 0x1f6   : > { %v354_v22 = vmax.f32 %v353_v21, 0.0 }
 0x1f8   : > { %v356_v23 = vmul.f32 %v355_v20, %v354_v22 }
 0x1fa   : > { %v357_v24 = vsel %vm350_vm4, %v356_v23, 0.0 }
 0x1fb   : > { %v358_v25 = vrot.slane %v357_v24, 4 }
 0x1fd   : > { %v359_v26 = vadd.f32 %v358_v25, %v357_v24 }
 0x1ff   : > { %v360_v27 = vrot.slane %v359_v26, 2 }
 0x201   : > { %v361_v28 = vadd.f32 %v360_v27, %v359_v26 }
 0x203   : > { %v362_v29 = vrot.slane %v361_v28, 1 }
 0x205   : > { %v363_v30 = vadd.f32 %v362_v29, %v361_v28 }
 0x207   : > { %v497_v31 = vmul.f32 -1.442695, %v363_v30 }
 0x209   : > { %558 = vpow2.f32 %v497_v31 }
 0x213   : > { %v559_v32 = vpop.eup %558 }
 0x214   : > { %v367_v33 = vadd.f32 1.0, %v559_v32 }
 0x216   : > { %560 = vrcp.f32 %v367_v33 }
 0x220   : > { %v561_v34 = vpop.eup %560 }
 0x221   : > { %371 = vbcast.lane.b32.xlu0 %v561_v34, 256 }
 0x225   : > { %375 = vbcast.lane.b32.xlu0 %v561_v34, 264 }
 0x229   : > { %379 = vbcast.lane.b32.xlu0 %v561_v34, 272 }
 0x22d   : > { %383 = vbcast.lane.b32.xlu0 %v561_v34, 280 }
 0x293   : > { %v372_v35 = vpop.permute.xlu0 %371 }
 0x294   : > { %v385_v36 = vmul.f32 %v372_v35, %v805_v2  ;;  %v386_v37 = vmul.f32 %v372_v35, %v809_v4 }
 0x296   : > { %393 = vst [vmem:[%s188_s8] sm:$0xff] %v385_v36  ;;  %394 = vst [vmem:[%s188_s8 + $0x8] sm:$0xff] %v386_v37 }
 0x297   : > { %v376_v38 = vpop.permute.xlu0 %375 }
 0x298   : > { %v387_v39 = vmul.f32 %v376_v38, %v817_v8  ;;  %v388_v40 = vmul.f32 %v376_v38, %v819_v9 }
 0x29a   : > { %395 = vst [vmem:[%s188_s8 + $0x10] sm:$0xff] %v387_v39  ;;  %396 = vst [vmem:[%s188_s8 + $0x18] sm:$0xff] %v388_v40 }
 0x29b   : > { %v380_v41 = vpop.permute.xlu0 %379 }
 0x29c   : > { %v389_v42 = vmul.f32 %v380_v41, %v801_v0  ;;  %v390_v2 = vmul.f32 %v380_v41, %v803_v1 }
 0x29e   : > { %397 = vst [vmem:[%s188_s8 + $0x20] sm:$0xff] %v389_v42  ;;  %398 = vst [vmem:[%s188_s8 + $0x28] sm:$0xff] %v390_v2 }
 0x29f   : > { %v384_v4 = vpop.permute.xlu0 %383 }
 0x2a0   : > { %v391_v8 = vmul.f32 %v384_v4, %v811_v5  ;;  %v392_v0 = vmul.f32 %v384_v4, %v813_v6 }
 0x2a2   : > { %399 = vst [vmem:[%s188_s8 + $0x30] sm:$0xff] %v391_v8  ;;  %400 = vst [vmem:[%s188_s8 + $0x38] sm:$0xff] %v392_v0 }
 0x2a3   : > { %605 = shalt.err (!%p602_p2)
}
 0x2a4   : > { %s606_s9 = scalar_lea.hbm %s845_s26, 1024  ;;  %s610_s23 = scalar_lea.hbm %s894_s3, 2048 }
 0x2a5   : > { %p607_p4 = scmp.ne.s32.totalorder %s845_s26, %s606_s9  ;;  %p611_p9 = scmp.lt.u32.totalorder %s845_s26, %s894_s3 }
 0x2a6   : > { %p612_p1 = scmp.lt.u32.totalorder %s610_s23, %s606_s9  ;;  %p614_p6 = scmp.lt.u32.totalorder %s606_s9, %s845_s26 }
 0x2a7   : > { %p608_p5 = pnand %p607_p4, %p901_p11 }
 0x2a8   : > { %p613_p3 = por %p612_p1, %p611_p9 }
 0x2a9   : > { %p609_p7 = pneg %p608_p5 }
 0x2aa   : > { %p615_p12 = por %p614_p6, %p613_p3 }
 0x2ac   : > { %p616_p13 = pnand %p615_p12, %p609_p7 }
 0x2ae   : > { %619 = shalt.err (!%p616_p13)
}
 0x2af   : > { %s665_s7 = smov 256   ;;  %s666_s8 = smov 16  }
 0x2b0   : > { %507 = dma.vmem_to_hbm [thread:$0]  (%p901_p11), %s840_s17, 1024, %s845_s26, %s402_s16, %s665_s7, %s665_s7, %s666_s8  }
 0x2b1 PF: > { %s430_s19 = sand.u32 1, %s646_s12   ;;  %p902_p8 = scmp.ne.s32.totalorder %s899_s25, 0 }
 0x2b2   : > { %p903_p10 = scmp.ge.s32.totalorder %s658_s15, 2  ;;  %s431_s20 = scalar_lea.sflag [#allocation4], %s430_s19 }
 0x2b4   : > { %p514_p0 = pnand %p903_p10, %p902_p8 }
 0x2b6   : > { %641 = dma.done.wait (!%p514_p0), %s431_s20, 1024  }
 0x2b7   : > { %643 = vsyncadd (!%p514_p0), %s431_s20, 4294966272  ;;  %p16_p2 = scmp.ge.s32.totalorder %s712_s18, 4   ;;  %s904_s12 = smov %s650_s13 }
 0x2b8   : > { %s905_s13 = smov %s654_s14  ;;  %s906_s14 = smov %s724_s21 }
 0x2b9   : > { %s907_s15 = smov %s712_s18  ;;  %18 = sbr.rel (!%p16_p2) target bundleno = 5 (0x5), region = 77 }
 0x2c0   :  { %436 = vsyncpa [#allocation3], 1 }
 0x2c1   :  { %438 = vsyncpa [#allocation3 + $0x1], 1 }
 0x2c2   :  { %439 = vsyncpa [#allocation4], 1 }
 0x2c3   :  { %441 = vsyncpa [#allocation4 + $0x1], 1 }

</bundles_post_ra>
